<compile_context>
chip_gen: v7x
topology: tpu7x:2x2x1
jax: 0.10.0
libtpu: 0.0.40
codegen_flags: <defaults>
</compile_context>

<pallas_src>
import jax
import jax.numpy as jnp
from jax import lax
from jax.experimental import pallas as pl
from jax.experimental.pallas import tpu as pltpu


def _cmix_kernel(x_ref, halo_ref, xk_ref, kw_ref, vw_ref, o_ref, k_sc, acc_ref):
    # x_ref:    (1, TILE_T, C)  f32   one (batch, T-tile) block
    # halo_ref: (1, 1, 1, C)    f32   previous token of this tile (zeros for tile 0)
    # xk_ref:   (1, 1, C)       f32
    # kw_ref:   (C, TILE_H)     bf16  key-weight chunk
    # vw_ref:   (TILE_H, C)     bf16  value-weight chunk
    # o_ref:    (1, TILE_T, C)
    # k_sc:     (TILE_T, C)     bf16  cached mixed input (per (b, t) tile)
    # acc_ref:  (TILE_T, C)     f32   output accumulator over hidden chunks
    h_idx = pl.program_id(2)
    n_h = pl.num_programs(2)

    @pl.when(h_idx == 0)
    def _():
        x = x_ref[0]                                  # (TILE_T, C)
        prev = halo_ref[0, 0]                         # (1, C) previous token
        rolled = pltpu.roll(x, shift=1, axis=0)       # rolled[i] = x[i-1] (row 0 wraps)
        t_idx = lax.broadcasted_iota(jnp.int32, x.shape, 0)
        shifted = jnp.where(t_idx == 0, prev, rolled)  # fix row 0 with the halo row
        k = x + (shifted - x) * xk_ref[0]             # f32 elementwise mix
        k_sc[...] = k.astype(k_sc.dtype)              # cache in bf16 for the MXU
        acc_ref[...] = jnp.zeros_like(acc_ref)

    # hidden-chunk GEMMs: bf16 inputs, f32 accumulation
    hh = jnp.dot(k_sc[...], kw_ref[...], preferred_element_type=jnp.float32)
    hh = jnp.maximum(hh, 0.0)
    hh = hh * hh
    acc_ref[...] += jnp.dot(hh.astype(vw_ref.dtype), vw_ref[...],
                            preferred_element_type=jnp.float32)

    @pl.when(h_idx == n_h - 1)
    def _():
        o_ref[0] = acc_ref[...].astype(o_ref.dtype)


def rwkv_cmix_x070(x, x_k, key_w, value_w, *, tile_t=256, tile_h=1024):
    """x: (B,T,C) f32; x_k: (1,1,C); key_w: (C,4C); value_w: (4C,C)."""
    B, T, C = x.shape
    C4 = key_w.shape[1]
    assert key_w.shape == (C, C4) and value_w.shape == (C4, C)
    assert x_k.shape == (1, 1, C)

    # Clamp/align tile sizes (fall back to full extent if they don't divide evenly).
    tile_t = min(tile_t, T)
    if T % tile_t != 0 or (tile_t != T and tile_t % 8 != 0):
        tile_t = T
    tile_h = min(tile_h, C4)
    if C4 % tile_h != 0 or (tile_h != C4 and tile_h % 128 != 0):
        tile_h = C4
    n_tt = T // tile_t
    n_h = C4 // tile_h

    # bf16 weights: MXU-native inputs, half the weight DMA/VMEM.
    kw = key_w.astype(jnp.bfloat16)
    vw = value_w.astype(jnp.bfloat16)

    # Token-shift halo: one row per (batch, T-tile) = previous token of that tile,
    # zeros for the first tile (matches ZeroPad2d((0,0,1,-1)) semantics).
    halo = jnp.pad(x, ((0, 0), (1, 0), (0, 0)))[:, 0:T:tile_t, :]   # (B, n_tt, C)
    halo = halo.reshape(B, n_tt, 1, C)

    # Advisory cost estimate so XLA can overlap surrounding ops.
    flops = 4 * B * T * C * C4                         # two GEMMs, 2*M*K*N each
    bytes_accessed = (2 * B * T * C) * x.dtype.itemsize + (kw.size + vw.size) * 2

    # Scoped-VMEM estimate; only raise the limit above the 32 MiB default if needed.
    est = (2 * 2 * tile_t * C * 4                       # x in + out, double-buffered, f32
           + 2 * (C * tile_h + tile_h * C) * 2          # bf16 weight chunks, double-buffered
           + tile_t * C * 4                             # f32 accumulator
           + tile_t * C * 2                             # bf16 k scratch
           + 4 * tile_t * tile_h)                       # intermediate headroom
    vmem_limit = int(est * 1.25) + (2 << 20) if est > (30 << 20) else None

    grid_spec = pltpu.PrefetchScalarGridSpec(
        num_scalar_prefetch=0,
        grid=(B, n_tt, n_h),
        in_specs=[
            pl.BlockSpec((1, tile_t, C), lambda b, t, h: (b, t, 0)),    # x tile
            pl.BlockSpec((1, 1, 1, C), lambda b, t, h: (b, t, 0, 0)),   # halo row
            pl.BlockSpec((1, 1, C), lambda b, t, h: (0, 0, 0)),         # x_k (replicated)
            pl.BlockSpec((C, tile_h), lambda b, t, h: (0, h)),          # key-weight chunk
            pl.BlockSpec((tile_h, C), lambda b, t, h: (h, 0)),          # value-weight chunk
        ],
        out_specs=pl.BlockSpec((1, tile_t, C), lambda b, t, h: (b, t, 0)),
        scratch_shapes=[
            pltpu.VMEM((tile_t, C), jnp.bfloat16),      # cached mixed k
            pltpu.VMEM((tile_t, C), jnp.float32),       # output accumulator
        ],
    )

    return pl.pallas_call(
        _cmix_kernel,
        out_shape=jax.ShapeDtypeStruct((B, T, C), x.dtype),
        grid_spec=grid_spec,
        compiler_params=pltpu.CompilerParams(
            dimension_semantics=("parallel", "parallel", "arbitrary"),
            vmem_limit_bytes=vmem_limit),
        cost_estimate=pl.CostEstimate(
            flops=flops, transcendentals=0, bytes_accessed=bytes_accessed),
    )(x, halo, x_k, kw, vw)


def reference(x, x_k, key_w, value_w):
    shifted = jnp.pad(x, ((0, 0), (1, 0), (0, 0)))[:, :-1, :]
    xx = shifted - x
    k = x + xx * x_k
    h = jnp.maximum(k @ key_w, 0.0) ** 2
    return h @ value_w


if __name__ == "__main__":
    # Small config consistent with the module (n_embd=C, dim_ffn=4C), sized so the
    # grid exercises multiple T tiles (halo path) and multiple hidden chunks.
    B, T, C = 2, 16, 64
    C4 = 4 * C
    n_layer, layer_id = 4, 1

    # Deterministic parameter init mirroring __init__:
    ratio_1_to_almost0 = 1.0 - layer_id / n_layer
    ddd = (jnp.arange(C, dtype=jnp.float32) / C).reshape(1, 1, C)
    x_k = 1.0 - jnp.power(ddd, ratio_1_to_almost0 ** 4)               # (1,1,C)

    key0 = jax.random.PRNGKey(0)
    k_key, k_val, k_x = jax.random.split(key0, 3)
    bound = 0.5 / (C ** 0.5)
    # torch Linear stores weight (out, in); we store transposed (in, out).
    key_w = jax.random.uniform(k_key, (C, C4), jnp.float32, -bound, bound)
    # NOTE: the module zero-initializes value.weight; we use small random values
    # here so the numerical check actually exercises the second matmul.
    value_w = jax.random.uniform(k_val, (C4, C), jnp.float32, -bound, bound)

    x = jax.random.normal(k_x, (B, T, C), jnp.float32)

    out = jax.block_until_ready(
        rwkv_cmix_x070(x, x_k, key_w, value_w, tile_t=8, tile_h=128))

    # Reference uses the same bf16-rounded weights so the only deltas are bf16
    # rounding of the activations inside the kernel (accumulation is f32).
    kw32 = key_w.astype(jnp.bfloat16).astype(jnp.float32)
    vw32 = value_w.astype(jnp.bfloat16).astype(jnp.float32)
    ref = reference(x, x_k, kw32, vw32)

    assert out.shape == (B, T, C)
    assert jnp.allclose(out, ref, atol=2e-2, rtol=2e-2), \
        float(jnp.max(jnp.abs(out - ref)))

    print("KERNEL_OK")
</pallas_src>

<mosaic_0001>
module attributes {stable_mosaic.version = 11 : i64} {
  func.func @_cmix_kernel(%arg0: i32, %arg1: i32, %arg2: i32, %arg3: memref<1x8x64xf32, #tpu.memory_space<vmem>>, %arg4: memref<1x1x1x64xf32, #tpu.memory_space<vmem>>, %arg5: memref<1x1x64xf32, #tpu.memory_space<vmem>>, %arg6: memref<64x128xbf16, #tpu.memory_space<vmem>>, %arg7: memref<128x64xbf16, #tpu.memory_space<vmem>>, %arg8: memref<1x8x64xf32, #tpu.memory_space<vmem>>, %arg9: memref<8x64xbf16, #tpu.memory_space<vmem>>, %arg10: memref<8x64xf32, #tpu.memory_space<vmem>>) attributes {dimension_semantics = [#tpu.dimension_semantics<parallel>, #tpu.dimension_semantics<parallel>, #tpu.dimension_semantics<arbitrary>], iteration_bounds = array<i64: 2, 2, 2>, scalar_prefetch = 0 : i64, scratch_operands = 2 : i64, tpu.core_type = #tpu.core_type<tc>, window_params = [{transform_indices = @transform_0, window_bounds = array<i64: 1, 8, 64>}, {transform_indices = @transform_1, window_bounds = array<i64: 1, 1, 1, 64>}, {pipeline_mode = #tpu.pipeline_mode<synchronous>, transform_indices = @transform_2, window_bounds = array<i64: 1, 1, 64>}, {transform_indices = @transform_3, window_bounds = array<i64: 64, 128>}, {transform_indices = @transform_4, window_bounds = array<i64: 128, 64>}, {transform_indices = @transform_5, window_bounds = array<i64: 1, 8, 64>}]} {
    %c0_i32 = arith.constant 0 : i32
    %0 = arith.cmpi eq, %arg2, %c0_i32 : i32
    %1 = arith.extui %0 : i1 to i32
    %c0_i32_0 = arith.constant 0 : i32
    %2 = arith.cmpi ne, %1, %c0_i32_0 : i32
    scf.if %2 {
      %c0_13 = arith.constant 0 : index
      %c0_14 = arith.constant 0 : index
      %c0_15 = arith.constant 0 : index
      %18 = vector.load %arg3[%c0_13, %c0_14, %c0_15] : memref<1x8x64xf32, #tpu.memory_space<vmem>>, vector<1x8x64xf32>
      %19 = vector.shape_cast %18 : vector<1x8x64xf32> to vector<8x64xf32>
      %c0_16 = arith.constant 0 : index
      %c0_17 = arith.constant 0 : index
      %c0_18 = arith.constant 0 : index
      %c0_19 = arith.constant 0 : index
      %20 = vector.load %arg4[%c0_16, %c0_17, %c0_18, %c0_19] : memref<1x1x1x64xf32, #tpu.memory_space<vmem>>, vector<1x1x1x64xf32>
      %21 = vector.shape_cast %20 : vector<1x1x1x64xf32> to vector<1x64xf32>
      %c1_i32_20 = arith.constant 1 : i32
      %22 = tpu.dynamic_rotate %19 by %c1_i32_20 dim 0 : vector<8x64xf32>, i32 -> vector<8x64xf32>
      %23 = tpu.iota {dimensions = array<i32: 0>} : vector<8x64xi32>
      %c0_i32_21 = arith.constant 0 : i32
      %24 = vector.broadcast %c0_i32_21 : i32 to vector<8x64xi32>
      %25 = arith.cmpi eq, %23, %24 : vector<8x64xi32>
      %26 = vector.shape_cast %21 : vector<1x64xf32> to vector<1x64xf32>
      %27 = vector.broadcast %26 : vector<1x64xf32> to vector<8x64xf32>
      %28 = arith.select %25, %27, %22 : vector<8x64xi1>, vector<8x64xf32>
      %29 = arith.subf %28, %19 : vector<8x64xf32>
      %c0_22 = arith.constant 0 : index
      %c0_23 = arith.constant 0 : index
      %c0_24 = arith.constant 0 : index
      %30 = vector.load %arg5[%c0_22, %c0_23, %c0_24] : memref<1x1x64xf32, #tpu.memory_space<vmem>>, vector<1x1x64xf32>
      %31 = vector.shape_cast %30 : vector<1x1x64xf32> to vector<1x64xf32>
      %32 = vector.broadcast %31 : vector<1x64xf32> to vector<8x64xf32>
      %33 = arith.mulf %29, %32 : vector<8x64xf32>
      %34 = arith.addf %19, %33 : vector<8x64xf32>
      %35 = arith.truncf %34 : vector<8x64xf32> to vector<8x64xbf16>
      %c0_25 = arith.constant 0 : index
      %c0_26 = arith.constant 0 : index
      %36 = vector.load %arg9[%c0_25, %c0_26] : memref<8x64xbf16, #tpu.memory_space<vmem>>, vector<8x64xbf16>
      tpu.vector_store %arg9[%c0_25, %c0_26], %35 {strides = array<i32>} : memref<8x64xbf16, #tpu.memory_space<vmem>>, vector<8x64xbf16>,
      %cst_27 = arith.constant 0.000000e+00 : f32
      %37 = vector.broadcast %cst_27 : f32 to vector<8x64xf32>
      %c0_28 = arith.constant 0 : index
      %c0_29 = arith.constant 0 : index
      %38 = vector.load %arg10[%c0_28, %c0_29] : memref<8x64xf32, #tpu.memory_space<vmem>>, vector<8x64xf32>
      tpu.vector_store %arg10[%c0_28, %c0_29], %37 {strides = array<i32>} : memref<8x64xf32, #tpu.memory_space<vmem>>, vector<8x64xf32>,
    } else {
    }
    %c0 = arith.constant 0 : index
    %c0_1 = arith.constant 0 : index
    %3 = vector.load %arg9[%c0, %c0_1] : memref<8x64xbf16, #tpu.memory_space<vmem>>, vector<8x64xbf16>
    %c0_2 = arith.constant 0 : index
    %c0_3 = arith.constant 0 : index
    %4 = vector.load %arg6[%c0_2, %c0_3] : memref<64x128xbf16, #tpu.memory_space<vmem>>, vector<64x128xbf16>
    %cst = arith.constant dense<0.000000e+00> : vector<8x128xf32>
    %5 = tpu.matmul %3, %4, %cst {dimension_numbers = #tpu.dot_dimension_numbers<[1], [0], [0], [1], [0, 0, 1, 1], [], []>} : vector<8x64xbf16>, vector<64x128xbf16>, vector<8x128xf32> -> vector<8x128xf32>
    %cst_4 = arith.constant 0.000000e+00 : f32
    %6 = vector.broadcast %cst_4 : f32 to vector<8x128xf32>
    %7 = arith.maximumf %5, %6 : vector<8x128xf32>
    %8 = arith.mulf %7, %7 : vector<8x128xf32>
    %c0_5 = arith.constant 0 : index
    %c0_6 = arith.constant 0 : index
    %9 = vector.load %arg10[%c0_5, %c0_6] : memref<8x64xf32, #tpu.memory_space<vmem>>, vector<8x64xf32>
    %10 = arith.truncf %8 : vector<8x128xf32> to vector<8x128xbf16>
    %c0_7 = arith.constant 0 : index
    %c0_8 = arith.constant 0 : index
    %11 = vector.load %arg7[%c0_7, %c0_8] : memref<128x64xbf16, #tpu.memory_space<vmem>>, vector<128x64xbf16>
    %cst_9 = arith.constant dense<0.000000e+00> : vector<8x64xf32>
    %12 = tpu.matmul %10, %11, %cst_9 {dimension_numbers = #tpu.dot_dimension_numbers<[1], [0], [0], [1], [0, 0, 1, 1], [], []>} : vector<8x128xbf16>, vector<128x64xbf16>, vector<8x64xf32> -> vector<8x64xf32>
    %13 = arith.addf %9, %12 : vector<8x64xf32>
    %c0_10 = arith.constant 0 : index
    %c0_11 = arith.constant 0 : index
    %14 = vector.load %arg10[%c0_10, %c0_11] : memref<8x64xf32, #tpu.memory_space<vmem>>, vector<8x64xf32>
    tpu.vector_store %arg10[%c0_10, %c0_11], %13 {strides = array<i32>} : memref<8x64xf32, #tpu.memory_space<vmem>>, vector<8x64xf32>,
    %c1_i32 = arith.constant 1 : i32
    %15 = arith.cmpi eq, %arg2, %c1_i32 : i32
    %16 = arith.extui %15 : i1 to i32
    %c0_i32_12 = arith.constant 0 : i32
    %17 = arith.cmpi ne, %16, %c0_i32_12 : i32
    scf.if %17 {
      %c0_13 = arith.constant 0 : index
      %c0_14 = arith.constant 0 : index
      %18 = vector.load %arg10[%c0_13, %c0_14] : memref<8x64xf32, #tpu.memory_space<vmem>>, vector<8x64xf32>
      %c0_15 = arith.constant 0 : index
      %c0_16 = arith.constant 0 : index
      %c0_17 = arith.constant 0 : index
      %19 = vector.load %arg8[%c0_15, %c0_16, %c0_17] : memref<1x8x64xf32, #tpu.memory_space<vmem>>, vector<1x8x64xf32>
      %20 = vector.shape_cast %19 : vector<1x8x64xf32> to vector<8x64xf32>
      %21 = vector.shape_cast %18 : vector<8x64xf32> to vector<1x8x64xf32>
      tpu.vector_store %arg8[%c0_15, %c0_16, %c0_17], %21 {strides = array<i32>} : memref<1x8x64xf32, #tpu.memory_space<vmem>>, vector<1x8x64xf32>,
    } else {
    }
    return
  }
  func.func @transform_0(%arg0: i32, %arg1: i32, %arg2: i32) -> (i32, i32, i32) {
    %c0_i32 = arith.constant 0 : i32
    %c0_i32_0 = arith.constant 0 : i32
    return %arg0, %arg1, %c0_i32 : i32, i32, i32
  }
  func.func @transform_1(%arg0: i32, %arg1: i32, %arg2: i32) -> (i32, i32, i32, i32) {
    %c0_i32 = arith.constant 0 : i32
    %c0_i32_0 = arith.constant 0 : i32
    %c0_i32_1 = arith.constant 0 : i32
    return %arg0, %arg1, %c0_i32, %c0_i32_0 : i32, i32, i32, i32
  }
  func.func @transform_2(%arg0: i32, %arg1: i32, %arg2: i32) -> (i32, i32, i32) {
    %c0_i32 = arith.constant 0 : i32
    %c0_i32_0 = arith.constant 0 : i32
    %c0_i32_1 = arith.constant 0 : i32
    %c0_i32_2 = arith.constant 0 : i32
    return %c0_i32, %c0_i32_0, %c0_i32_1 : i32, i32, i32
  }
  func.func @transform_3(%arg0: i32, %arg1: i32, %arg2: i32) -> (i32, i32) {
    %c0_i32 = arith.constant 0 : i32
    %c0_i32_0 = arith.constant 0 : i32
    return %c0_i32, %arg2 : i32, i32
  }
  func.func @transform_4(%arg0: i32, %arg1: i32, %arg2: i32) -> (i32, i32) {
    %c0_i32 = arith.constant 0 : i32
    %c0_i32_0 = arith.constant 0 : i32
    return %arg2, %c0_i32 : i32, i32
  }
  func.func @transform_5(%arg0: i32, %arg1: i32, %arg2: i32) -> (i32, i32, i32) {
    %c0_i32 = arith.constant 0 : i32
    %c0_i32_0 = arith.constant 0 : i32
    return %arg0, %arg1, %c0_i32 : i32, i32, i32
  }
}

</mosaic_0001>

<bundles_post_ra>
// kernel: tpu_custom_call.1
= control target key start
LH: loop header
LB: loop body
LE: loop exit
PB: predicated region body
PF: predicated region fallthrough
CT: control target
= control target key end

     0   :  { %s1357_s0 = inlined_call_operand.vmem [shape: f32[2,16,64], index: 0, kind: input, shape index: {}]   ;;  %s1358_s1 = inlined_call_operand.vmem [shape: f32[2,2,1,64], index: 1, kind: input, shape index: {}]   ;;  %s1359_s2 = inlined_call_operand.vmem [shape: f32[1,1,64], index: 2, kind: input, shape index: {}]   ;;  %s1360_s3 = inlined_call_operand.vmem [shape: bf16[64,256], index: 3, kind: input, shape index: {}]   ;;  %s1361_s4 = inlined_call_operand.vmem [shape: bf16[256,64], index: 4, kind: input, shape index: {}]   ;;  %s1362_s5 = inlined_call_operand.hbm [shape: f32[2,16,64], index: 5, kind: output, shape index: {}]  }
   0x1   :  { %1373 = sst [smem:[#allocation19_spill]] %s1360_s3 }
   0x2   :  { %10 = vsyncpa [#allocation6], 0 }
   0x3   :  { %12 = vsyncpa [#allocation6 + $0x1], 0  ;;  %s1127_s18 = smov 0   ;;  %s1129_s19 = smov 0  }
   0x4   :  { %s1131_s20 = smov 0   ;;  %s1133_s21 = smov 0  }
   0x5   :  { %s1135_s22 = smov 0   ;;  %s1137_s23 = smov 0  }
   0x6   :  { %s1139_s24 = smov 0   ;;  %s1141_s25 = smov 0  }
   0x7   :  { %s1143_s26 = smov 0   ;;  %s1145_s27 = smov 0  }
   0x8   :  { %s1147_s28 = smov 0   ;;  %s1149_s29 = smov 0  }
   0x9 LB: > { %1374 = sst [smem:[#allocation8_spill]] %s1055_s20  ;;  %s765_s30 = sadd.s32 4294967295, %s1091_s29   ;;  %s1091_s29 = sphi %s1149_s29, %s18_s29   ;;  %s1087_s28 = sphi %s1147_s28, %s1400_s28   ;;  %s1083_s27 = sphi %s1145_s27, %s1399_s27   ;;  %s1079_s26 = sphi %s1143_s26, %s1404_s26   ;;  %s1075_s25 = sphi %s1141_s25, %s1397_s25   ;;  %s1071_s24 = sphi %s1139_s24, %s1396_s24   ;;  %s1067_s23 = sphi %s1137_s23, %s1395_s23   ;;  %s1063_s22 = sphi %s1135_s22, %s1394_s22   ;;  %s1059_s21 = sphi %s1133_s21, %s1393_s21   ;;  %s1055_s20 = sphi %s1131_s20, %s1403_s20   ;;  %s1051_s19 = sphi %s1129_s19, %s1402_s19   ;;  %s1047_s18 = sphi %s1127_s18, %s1401_s18  }
   0xa   : > { %1375 = sst [smem:[#allocation9_spill]] %s1063_s22  ;;  %s766_s6 = sadd.s32 4294967294, %s1091_s29  }
   0xb   : > { %1376 = sst [smem:[#allocation10_spill]] %s1079_s26  ;;  %s30_s7 = sadd.s32 1, %s1079_s26 }
   0xc   : > { %1377 = sst [smem:[#allocation11_spill]] %s1083_s27  ;;  %p31_p0 = scmp.ge.s32.totalorder %s30_s7, 2 }
   0xd   : > { %1378 = sst [smem:[#allocation12_spill]] %s1087_s28  ;;  %s33_s8 = sadd.s32 1, %s1083_s27 }
   0xe   : > { %s37_s9 = sadd.s32 1, %s1087_s28  ;;  %p128_p1 = scmp.ne.s32.totalorder %s1063_s22, %s1059_s21 }
   0xf   : > { %s1406_s7 = smov (%p31_p0, %s30_s7), 0  ;;  %s1408_s8 = smov (!%p31_p0, %s33_s8), %s1083_s27 }
  0x10   : > { %1379 = sst [smem:[#allocation13_spill]] %s1406_s7  ;;  %s118_s10 = ssub.s32 %s1079_s26, %s1406_s7 }
  0x11   : > { %p129_p2 = scmp.eq.s32.totalorder %s1091_s29, 0  ;;  %p35_p3 = scmp.ge.s32.totalorder %s1408_s8, 2 }
  0x12   : > { %p119_p4 = scmp.eq.s32.totalorder %s118_s10, 0  ;;  %s121_s11 = sadd.s32 1, %s1063_s22 }
  0x13   : > { %p1201_p5 = por %p129_p2, %p128_p1  ;;  %s1410_s8 = smov (%p35_p3, %s1408_s8), 0 }
  0x14   : > { %1381 = sst [smem:[#allocation14_spill]] %s1410_s8  ;;  %s1412_s9 = smov (!%p35_p3, %s37_s9), %s1087_s28 }
  0x15   : > { %s1209_s13 = scalar_select %p119_p4, %s1063_s22, %s121_s11  }
  0x16   : > { %p39_p6 = scmp.ge.s32.totalorder %s1412_s9, 2  ;;  %s171_s14 = ssub.s32 %s1083_s27, %s1410_s8 }
  0x17   : > { %1382 = sst [smem:[#allocation15_spill]] %s1209_s13  ;;  %p185_p7 = scmp.ne.s32.totalorder %s1055_s20, %s1051_s19 }
  0x18   : > { %p186_p8 = scmp.eq.s32.totalorder %s765_s30, 7  ;;  %s1414_s9 = smov (%p39_p6, %s1412_s9), 0 }
  0x19   : > { %1383 = sst [smem:[#allocation16_spill]] %s1414_s9  ;;  %p191_p10 = scmp.ne.s32.totalorder %s1051_s19, %s1047_s18 }
  0x1a   : > { %p1217_p9 = por %p186_p8, %p185_p7  ;;  %s170_s16 = ssub.s32 %s1087_s28, %s1414_s9 }
  0x1b   : > { %p192_p11 = scmp.eq.s32.totalorder %s766_s6, 7  ;;  %s172_s17 = sor.u32 %s171_s14, %s170_s16 }
  0x1c   : > { %s175_s10 = sadd.s32 1, %s1055_s20  ;;  %p173_p12 = scmp.eq.s32.totalorder %s172_s17, 0 }
  0x1d   : > { %p1226_p13 = por %p192_p11, %p191_p10  ;;  %p768_p0 = scmp.ge.s32.totalorder %s1091_s29, 8 }
  0x1e   : > { %s1231_s8 = scalar_select %p173_p12, %s1055_s20, %s175_s10  }
  0x1f   : > { %s1385_s11 = scalar_select %p1226_p13, 1, 0 }
  0x20   : > { %1387 = sst [smem:[#allocation18_spill]] %s1231_s8  ;;  %211 = sbr.rel (%p768_p0) target bundleno = 54 (0x36), region = 20 }
  0x21   : > { %1386 = sst [smem:[#allocation17_spill]] %s1385_s11 }
  0x27   : > { %235 = sbr.rel (!%p1201_p5) target bundleno = 54 (0x36), region = 32  ;;  %s237_s30 = sand.u32 (%p1201_p5), 1, %s1063_s22  }
  0x28   : > { %s770_s9 = sshll.u32 (%p1201_p5), %s1079_s26, 2  ;;  %s769_s6 = sshll.u32 (%p1201_p5), %s237_s30, 5 }
  0x29   : > { %s1388_s3 = sld [smem:[#allocation19_spill]] (%p1201_p5)  ;;  %s239_s7 = scalar_lea.vmem (%p1201_p5), [#allocation4], %s769_s6 }
  0x2f   : > { %s241_s17 = scalar_lea.vmem %s1388_s3, %s770_s9 }
  0x30   : > { %v257_v0 = vld [vmem:[%s241_s17] sm:$0xf]  ;;  %v259_v1 = vld [vmem:[%s241_s17 + $0x8] sm:$0xf]  ;;  %v261_v2 = vld [vmem:[%s241_s17 + $0x10] sm:$0xf] }
  0x31   : > { %258 = vst [vmem:[%s239_s7] sm:$0xf] %v257_v0  ;;  %260 = vst [vmem:[%s239_s7 + $0x4] sm:$0xf] %v259_v1  ;;  %v263_v3 = vld [vmem:[%s241_s17 + $0x18] sm:$0xf] }
  0x32   : > { %v265_v4 = vld [vmem:[%s241_s17 + $0x20] sm:$0xf]  ;;  %262 = vst [vmem:[%s239_s7 + $0x8] sm:$0xf] %v261_v2  ;;  %264 = vst [vmem:[%s239_s7 + $0xc] sm:$0xf] %v263_v3 }
  0x33   : > { %266 = vst [vmem:[%s239_s7 + $0x10] sm:$0xf] %v265_v4  ;;  %v267_v5 = vld [vmem:[%s241_s17 + $0x28] sm:$0xf]  ;;  %v269_v6 = vld [vmem:[%s241_s17 + $0x30] sm:$0xf] }
  0x34   : > { %v271_v7 = vld [vmem:[%s241_s17 + $0x38] sm:$0xf]  ;;  %268 = vst [vmem:[%s239_s7 + $0x14] sm:$0xf] %v267_v5  ;;  %270 = vst [vmem:[%s239_s7 + $0x18] sm:$0xf] %v269_v6 }
  0x35   : > { %272 = vst [vmem:[%s239_s7 + $0x1c] sm:$0xf] %v271_v7 }
  0x36 PF: > { %p771_p1 = scmp.ge.s32.totalorder %s1091_s29, 1  ;;  %p319_p2 = scmp.lt.s32.totalorder %s1091_s29, 9 }
  0x38   : > { %p320_p3 = pnand %p771_p1, %p319_p2 }
  0x39   : > { %s326_s9 = sand.u32 (!%p320_p3), 1, %s1059_s21   ;;  %s1369_s12 = sand.u32 (!%p320_p3), 1, %s1051_s19  }
  0x3a   : > { %323 = sbr.rel (%p320_p3) target bundleno = 568 (0x238), region = 77  ;;  %s772_s10 = sshll.u32 (!%p320_p3), %s326_s9, 5 }
  0x3b   : > { %s1247_s7 = sshll.u32 (!%p320_p3), %s1369_s12, 3  ;;  %p373_p4 = scmp.lt.s32.totalorder (!%p320_p3), %s1075_s25, 1 }
  0x3c   : > { %p375_p5 = scmp.lt.s32.totalorder (!%p320_p3), %s1071_s24, 1  ;;  %s777_s30 = sshll.u32 (!%p320_p3), %s1067_s23, 4 }
  0x3d   : > { %p389_p6 = scmp.lt.s32.totalorder (!%p320_p3), %s777_s30, 31  ;;  %s1265_s11 = scalar_lea.vmem (!%p320_p3), [#allocation4], %s772_s10 }
  0x3e   : > { %p779_p7 = scmp.ne.s32.totalorder (!%p320_p3), %s1067_s23, 0 }
  0x41   : > { %s374_s6 = scalar_select %p373_p4, %s1075_s25, 1 }
  0x42   : > { %s376_s14 = scalar_select %p375_p5, %s1071_s24, 1 }
  0x43   : > { %s774_s16 = sshll.u32 %s374_s6, 1  ;;  %s1416_s30 = smov (!%p389_p6, %s777_s30), 31  ;;  %v402_v9 = vlaneseq (!%p779_p7)  ;;  %vm425_vm0 = vcmask (!%p779_p7), 523264   ;;  %v1093_v13 = vmov (!%p779_p7), 0.0   ;;  %v781_v15 = vld [vmem:[%s1359_s2] ss:$0 sm:$0xff] (!%p779_p7) }
  0x44   : > { %s378_s17 = sadd.s32 %s774_s16, %s376_s14  ;;  %s778_s12 = sshll.u32 %s1416_s30, 2  ;;  %426 = vst.msk [vmem:[#allocation3] sm:$0xff] (!%p779_p7), %vm425_vm0, %v1093_v13  ;;  %vm423_vm2 = vcmask (!%p779_p7), 519168  }
  0x45   : > { %s775_s3 = sshll.u32 %s378_s17, 3  ;;  %s387_s26 = scalar_lea.vmem %s1358_s1, %s378_s17  ;;  %v403_v12 = vshrl.u32 (!%p779_p7), %v402_v9, 7 }
  0x46   : > { %s380_s9 = scalar_lea.vmem %s1357_s0, %s775_s3  ;;  %s1263_s20 = scalar_lea.vmem %s1361_s4, %s778_s12  ;;  %v780_v11 = vld [vmem:[%s387_s26] ss:$0 sm:$0xff] (!%p779_p7) }
  0x47   : > { %s372_s6 = scalar_lea.vmem [#allocation5], %s1247_s7  ;;  %398 = sbr.rel (%p779_p7) target bundleno = 84 (0x54), region = 85  ;;  %v399_v8 = vld [vmem:[%s380_s9] sm:$0xff] (!%p779_p7)  ;;  %vm404_vm1 = vcmp.eq.s32.totalorder (!%p779_p7), %v403_v12, 0 }
  0x48   : > { %v401_v10 = vrot.slane (!%p779_p7), %v399_v8, 7 }
  0x4a   : > { %v411_v14 = vsel (!%p779_p7), %vm404_vm1, %v780_v11, %v401_v10 }
  0x4b   : > { %v412_v16 = vsub.f32 (!%p779_p7), %v411_v14, %v399_v8 }
  0x4d   : > { %v420_v17 = vmul.f32 (!%p779_p7), %v781_v15, %v412_v16 }
  0x4f   : > { %v421_v18 = vadd.f32 %v420_v17, %v399_v8 }
  0x51   : > { %v422_v19 = vpack.c.bf16 %v421_v18, %v421_v18 }
  0x53   : > { %424 = vst.msk [vmem:[#allocation2] sm:$0xf] %vm423_vm2, %v422_v19 }
  0x54 PF: > { %v953_v20 = vld [vmem:[%s1265_s11] sm:$0xff]   ;;  %v1094_v21 = vmov 0.0   ;;  %v954_v22 = vld [vmem:[%s1265_s11 + $0x8] sm:$0xff]   ;;  %vm1095_vm3 = vmmov 0   ;;  %v957_v23 = vld [vmem:[%s1263_s20] sm:$0xff]   ;;  %vm460_vm4 = vcmask 523264  }
  0x55   : > { %815 = vmatprep.subr.bf16.mxu0 %v1094_v21  ;;  %827 = vmatprep.subr.bf16.mxu1 %v1094_v21  ;;  %v955_v24 = vld [vmem:[%s1265_s11 + $0x10] sm:$0xff]   ;;  %v958_v25 = vld [vmem:[%s1263_s20 + $0x8] sm:$0xff]   ;;  %v959_v27 = vld [vmem:[%s1263_s20 + $0x10] sm:$0xff]   ;;  %p795_p8 = scmp.ne.s32.totalorder %s1067_s23, 1 }
  0x56   : > { %816 = vmatpush3.bf16.msra.mxu0 %v953_v20  ;;  %823 = vmatprep.mubr.msk.bf16.mxu0 %vm1095_vm3, %v1094_v21  ;;  %v956_v26 = vld [vmem:[%s1265_s11 + $0x18] sm:$0xff]   ;;  %v960_v29 = vld [vmem:[%s1263_s20 + $0x18] sm:$0xff]   ;;  %v963_v32 = vld [vmem:[%s1263_s20 + $0x30] sm:$0xff]  }
  0x57   : > { %817 = vmatprep.subr.bf16.mxu0 %v1094_v21  ;;  %843 = vmatprep.mubr.msk.bf16.mxu1 %vm1095_vm3, %v1094_v21  ;;  %v961_v30 = vld [vmem:[%s1263_s20 + $0x20] sm:$0xff]   ;;  %v962_v31 = vld [vmem:[%s1263_s20 + $0x28] sm:$0xff]   ;;  %v964_v33 = vld [vmem:[%s1263_s20 + $0x38] sm:$0xff]  }
  0x58   : > { %828 = vmatpush3.bf16.msra.mxu1 %v957_v23  ;;  %v506_v41 = vld [vmem:[#allocation3] sm:$0xff] }
  0x59   : > { %829 = vmatprep.subr.bf16.mxu1 %v1094_v21 }
  0x5a   : > { %818 = vmatpush3.bf16.msra.mxu0 %v954_v22  ;;  %v427_v28 = vld [vmem:[#allocation2] sm:$0xf] }
  0x5b   : > { %819 = vmatprep.subr.bf16.mxu0 %v1094_v21 }
  0x5c   : > { %830 = vmatpush3.bf16.msra.mxu1 %v958_v25 }
  0x5d   : > { %831 = vmatprep.subr.bf16.mxu1 %v1094_v21 }
  0x5e   : > { %820 = vmatpush3.bf16.msra.mxu0 %v955_v24 }
  0x5f   : > { %821 = vmatprep.subr.bf16.mxu0 %v1094_v21 }
  0x60   : > { %832 = vmatpush3.bf16.msra.mxu1 %v959_v27 }
  0x61   : > { %833 = vmatprep.subr.bf16.mxu1 %v1094_v21 }
  0x62   : > { %822 = vmatpush3.bf16.msra.mxu0 %v956_v26 }
  0x64   : > { %834 = vmatpush3.bf16.msra.mxu1 %v960_v29 }
  0x65   : > { %824 = vmatmul.mubr.msk.bf16.vlgmr.msra.gmra.mrb[0].mxu0 %vm460_vm4, %v427_v28  ;;  %835 = vmatprep.subr.bf16.mxu1 %v1094_v21 }
  0x68   : > { %836 = vmatpush3.bf16.msra.mxu1 %v961_v30 }
  0x69   : > { %837 = vmatprep.subr.bf16.mxu1 %v1094_v21 }
  0x6c   : > { %838 = vmatpush3.bf16.msra.mxu1 %v962_v31 }
  0x6d   : > { %839 = vmatprep.subr.bf16.mxu1 %v1094_v21 }
  0x70   : > { %840 = vmatpush3.bf16.msra.mxu1 %v963_v32 }
  0x71   : > { %841 = vmatprep.subr.bf16.mxu1 %v1094_v21 }
  0x74   : > { %842 = vmatpush3.bf16.msra.mxu1 %v964_v33 }
 0x138   : > { %v498_v34 = vpop.f32.mrb[0].mxu0 }
 0x139   : > { %v504_v35 = vmax.f32 %v498_v34, 0.0  ;;  %v825_v36 = vpop.f32.mrb[1].mxu0 }
 0x13a   : > { %v501_v37 = vpop.f32.mrb[2].mxu0 }
 0x13b   : > { %v505_v38 = vmul.f32 %v504_v35, %v504_v35  ;;  %v826_v39 = vpop.f32.mrb[3].mxu0 }
 0x13d   : > { %v507_v40 = vpack.c.bf16 %v505_v38, %v505_v38 }
 0x13f   : > { %844 = vmatmul.mubr.bf16.vlgmr.msra.gmra.mrb[0].mxu1 %v507_v40 }
 0x20f   : > { %617 = sbr.rel (%p795_p8) target bundleno = 542 (0x21e), region = 89 }
 0x212   : > { %v606_v42 = vpop.f32.mrb[0].mxu1 }
 0x213   : > { %v612_v43 = vadd.f32 %v606_v42, %v506_v41  ;;  %v845_v44 = vpop.f32.mrb[1].mxu1 }
 0x214   : > { %v609_v45 = vpop.f32.mrb[2].mxu1 }
 0x215   : > { %613 = vst.msk [vmem:[#allocation3] sm:$0xff] %vm460_vm4, %v612_v43  ;;  %v846_v46 = vpop.f32.mrb[3].mxu1 }
 0x21c   : > { %v618_v47 = vld [vmem:[#allocation3] sm:$0xff] }
 0x21d   : > { %619 = vst.msk [vmem:[%s372_s6] sm:$0xff] %vm460_vm4, %v618_v47 }
 0x21e PF: > { %s797_s20 = sshll.u32 %s1075_s25, 1  ;;  %s636_s27 = sshll.u32 %s372_s6, 4  ;;  %s1294_s27 = int_to_ptr.vmem [resolvable:$true] %s636_s27 }
 0x21f   : > { %s632_s26 = sadd.s32 %s1071_s24, %s797_s20  ;;  %s1389_s11 = sand.u32 1, %s1051_s19  }
 0x220   : > { %s798_s28 = sshll.u32 %s632_s26, 7  ;;  %s621_s12 = scalar_lea.sflag [#allocation6], %s1389_s11 }
 0x221   : > { %s634_s13 = scalar_lea.hbm %s1362_s5, %s798_s28  ;;  %s965_s10 = scalar_lea.vmem %s1294_s27, 128 }
 0x222   : > { %p966_p10 = scmp.ne.s32.totalorder %s1294_s27, %s965_s10  ;;  %s1096_s24 = smov [#allocation5]  }
 0x223   : > { %s969_s25 = sshll.u32 %s1096_s24, 4  ;;  %s970_s25 = int_to_ptr.vmem [resolvable:$false] %s969_s25 }
 0x224   : > { %p967_p11 = pnand %p966_p10, %p1217_p9  ;;  %s971_s7 = scalar_lea.vmem %s970_s25, 256 }
 0x225   : > { %p972_p0 = scmp.lt.s32.totalorder %s1294_s27, %s970_s25  ;;  %p973_p1 = scmp.lt.s32.totalorder %s971_s7, %s965_s10 }
 0x226   : > { %p968_p12 = pneg %p967_p11 }
 0x227   : > { %p974_p2 = por %p973_p1, %p972_p0 }
 0x229   : > { %p975_p3 = pnand %p974_p2, %p968_p12 }
 0x22b   : > { %978 = shalt.err (!%p975_p3)
}
 0x22c   : > { %s979_s30 = scalar_lea.hbm %s634_s13, 128  ;;  %s983_s17 = scalar_lea.hbm %s1362_s5, 512 }
 0x22d   : > { %p980_p4 = scmp.ne.s32.totalorder %s634_s13, %s979_s30  ;;  %p984_p7 = scmp.lt.u32.totalorder %s634_s13, %s1362_s5 }
 0x22e   : > { %p985_p8 = scmp.lt.u32.totalorder %s983_s17, %s979_s30  ;;  %p987_p11 = scmp.lt.u32.totalorder %s979_s30, %s634_s13 }
 0x22f   : > { %p981_p5 = pnand %p980_p4, %p1217_p9 }
 0x230   : > { %p986_p10 = por %p985_p8, %p984_p7 }
 0x231   : > { %p982_p6 = pneg %p981_p5 }
 0x232   : > { %p988_p0 = por %p987_p11, %p986_p10 }
 0x234   : > { %p989_p12 = pnand %p988_p0, %p982_p6 }
 0x236   : > { %992 = shalt.err (!%p989_p12)
}
 0x237   : > { %847 = dma.vmem_to_hbm [thread:$0]  (%p1217_p9), %s1294_s27, 128, %s634_s13, %s621_s12  }
 0x238 PF: > { %p853_p1 = scmp.ge.s32.totalorder %s1091_s29, 2  ;;  %s648_s3 = sand.u32 1, %s1047_s18  }
 0x239   : > { %s649_s22 = scalar_lea.sflag [#allocation6], %s648_s3 }
 0x23a   : > { %p850_p2 = pnand %p853_p1, %p1226_p13 }
 0x23c   : > { %1042 = dma.done.wait (!%p850_p2), %s649_s22, 128  }
 0x23d   : > { %1044 = vsyncadd (!%p850_p2), %s649_s22, 4294967168  ;;  %s18_s29 = sadd.s32 1, %s1091_s29   ;;  %s1391_s20 = sld [smem:[#allocation8_spill]] }
 0x23e   : > { %p15_p3 = scmp.ge.s32.totalorder %s18_s29, 10   ;;  %s1392_s26 = sld [smem:[#allocation18_spill]] }
 0x23f   : > { %s1393_s21 = sld [smem:[#allocation9_spill]]  ;;  %s1394_s22 = sld [smem:[#allocation15_spill]] }
 0x240   : > { %s1395_s23 = sld [smem:[#allocation10_spill]]  ;;  %s1396_s24 = sld [smem:[#allocation11_spill]] }
 0x241   : > { %s1397_s25 = sld [smem:[#allocation12_spill]]  ;;  %s1398_s15 = sld [smem:[#allocation13_spill]] }
 0x242   : > { %s1399_s27 = sld [smem:[#allocation14_spill]]  ;;  %s1400_s28 = sld [smem:[#allocation16_spill]] }
 0x243   : > { %s1401_s18 = smov %s1051_s19  ;;  %s1402_s19 = smov %s1391_s20 }
 0x244   : > { %s1403_s20 = smov %s1392_s26  ;;  %17 = sbr.rel (!%p15_p3) target bundleno = 9 (0x9), region = 138 }
 0x247   : > { %s1404_s26 = smov %s1398_s15 }
 0x24b   :  { %654 = vsyncpa [#allocation6], 1 }
 0x24c   :  { %656 = vsyncpa [#allocation6 + $0x1], 1 }

</bundles_post_ra>
